<compile_context>
chip_gen: v7x
topology: tpu7x:2x2x1
jax: 0.10.0
libtpu: 0.0.40
codegen_flags: <defaults>
</compile_context>

<pallas_src>
import functools

import jax
import jax.numpy as jnp
from jax import lax
from jax.experimental import pallas as pl
from jax.experimental.pallas import tpu as pltpu

# Network dimensions (from the PyTorch module).
D_IN, H1, H2, D_OUT = 16, 64, 32, 6

# Packed parameter slab layout (rows x 128 lanes, f32):
#   rows   0:64   cols 0:16  -> W1 (64, 16)   ; col 16 -> b1 (64, 1)
#   rows  64:96   cols 0:64  -> W2 (32, 64)   ; col 64 -> b2 (32, 1)
#   rows  96:102  cols 0:32  -> W3 ( 6, 32)   ; col 32 -> b3 ( 6, 1)
SLAB_ROWS = 104   # 64 + 32 + 6 = 102, padded up to a multiple of 8 sublanes
SLAB_COLS = 128


def _round_up(n, m):
    return ((n + m - 1) // m) * m


def pack_params(w1, b1, w2, b2, w3, b3):
    """Pack (out, in) weights and (out,) biases into one lane-dense slab."""
    slab = jnp.zeros((SLAB_ROWS, SLAB_COLS), jnp.float32)
    slab = slab.at[0:H1, 0:D_IN].set(w1)
    slab = slab.at[0:H1, D_IN].set(b1)
    slab = slab.at[H1:H1 + H2, 0:H1].set(w2)
    slab = slab.at[H1:H1 + H2, H1].set(b2)
    slab = slab.at[H1 + H2:H1 + H2 + D_OUT, 0:H2].set(w3)
    slab = slab.at[H1 + H2:H1 + H2 + D_OUT, H2].set(b3)
    return slab


def policy_kernel(batch, xT_ref, slab_ref, o_ref, m_ref, l_ref):
    phase = pl.program_id(0)          # 0: accumulate softmax stats, 1: write output
    i = pl.program_id(1)              # batch-block index
    bm = xT_ref.shape[1]              # lanes per batch block (multiple of 128)

    # Static slices of the packed parameter slab (single DMA'd input).
    w1 = slab_ref[pl.ds(0, H1), pl.ds(0, D_IN)]                 # (64, 16)
    b1 = slab_ref[pl.ds(0, H1), pl.ds(D_IN, 1)]                 # (64, 1)
    w2 = slab_ref[pl.ds(H1, H2), pl.ds(0, H1)]                  # (32, 64)
    b2 = slab_ref[pl.ds(H1, H2), pl.ds(H1, 1)]                  # (32, 1)
    w3 = slab_ref[pl.ds(H1 + H2, D_OUT), pl.ds(0, H2)]          # (6, 32)
    b3 = slab_ref[pl.ds(H1 + H2, D_OUT), pl.ds(H2, 1)]          # (6, 1)

    x = xT_ref[...]                                             # (16, bm), batch on lanes

    # MLP with batch on the lane axis.  Dropout is identity in eval mode.
    h1 = jnp.maximum(jnp.dot(w1, x, preferred_element_type=jnp.float32) + b1, 0.0)   # (64, bm)
    h2 = jnp.maximum(jnp.dot(w2, h1, preferred_element_type=jnp.float32) + b2, 0.0)  # (32, bm)
    scores = jnp.dot(w3, h2, preferred_element_type=jnp.float32) + b3                # (6, bm)

    # Mask padded batch lanes so they do not contribute to the dim=0 softmax.
    neg_inf = jnp.float32(-jnp.inf)
    lane = lax.broadcasted_iota(jnp.int32, (D_OUT, bm), 1)
    scores = jnp.where((i * bm + lane) < batch, scores, neg_inf)

    @pl.when((phase == 0) & (i == 0))
    def _():
        m_ref[...] = jnp.full((D_OUT, 1), neg_inf, jnp.float32)
        l_ref[...] = jnp.zeros((D_OUT, 1), jnp.float32)

    @pl.when(phase == 0)
    def _():
        # Online max / sum-of-exp accumulation across batch blocks (per action row).
        m_old = m_ref[...]
        m_new = jnp.maximum(m_old, jnp.max(scores, axis=1, keepdims=True))
        l_ref[...] = l_ref[...] * jnp.exp(m_old - m_new) + jnp.sum(
            jnp.exp(scores - m_new), axis=1, keepdims=True)
        m_ref[...] = m_new

    @pl.when(phase == 1)
    def _():
        inv_l = pl.reciprocal(l_ref[...], approx=True)          # EUP, not VALU divide
        o_ref[...] = (jnp.exp(scores - m_ref[...]) * inv_l).astype(o_ref.dtype)


def policy_forward(x, slab, *, block_b=1024):
    """x: (B, 16) f32, slab: packed params.  Returns softmax(scores, dim=0), shape (B, 6)."""
    B = x.shape[0]
    assert x.shape[1] == D_IN

    bm = min(block_b, _round_up(B, 128))     # batch lanes per block (multiple of 128)
    nb = _round_up(B, bm) // bm              # number of batch blocks
    b_pad = nb * bm

    # Layout plumbing: transpose + zero-pad so batch maps to lanes (lane-dense).
    xT = jnp.zeros((D_IN, b_pad), jnp.float32).at[:, :B].set(x.astype(jnp.float32).T)

    out_t = pl.pallas_call(
        functools.partial(policy_kernel, B),
        out_shape=jax.ShapeDtypeStruct((D_OUT, b_pad), jnp.float32),
        grid_spec=pltpu.PrefetchScalarGridSpec(
            num_scalar_prefetch=0,
            grid=(2, nb),                                  # (phase, batch block)
            in_specs=[
                pl.BlockSpec((D_IN, bm), lambda p, i: (0, i)),            # streamed x^T
                pl.BlockSpec((SLAB_ROWS, SLAB_COLS), lambda p, i: (0, 0)),  # resident params
            ],
            out_specs=pl.BlockSpec((D_OUT, bm), lambda p, i: (0, i)),
            scratch_shapes=[
                pltpu.VMEM((D_OUT, 1), jnp.float32),       # running max  (per action row)
                pltpu.VMEM((D_OUT, 1), jnp.float32),       # running sum-of-exp
            ],
        ),
        compiler_params=pltpu.CompilerParams(
            # Both axes carry state (phase ordering / softmax accumulators), so
            # they must stay "arbitrary"; dim=0 softmax couples batch blocks.
            dimension_semantics=("arbitrary", "arbitrary"),
        ),
    )(xT, slab)

    return out_t[:, :B].T                                   # back to (B, 6)


def init_params(key):
    """nn.Linear-style init: U[-1/sqrt(fan_in), 1/sqrt(fan_in)].

    Weights are (out_features, in_features) — same layout as PyTorch — and
    biases are (out_features,).
    """
    keys = jax.random.split(key, 6)

    def lin(kw, kb, fan_in, fan_out):
        bound = 1.0 / (fan_in ** 0.5)
        w = jax.random.uniform(kw, (fan_out, fan_in), jnp.float32, -bound, bound)
        b = jax.random.uniform(kb, (fan_out,), jnp.float32, -bound, bound)
        return w, b

    w1, b1 = lin(keys[0], keys[1], D_IN, H1)
    w2, b2 = lin(keys[2], keys[3], H1, H2)
    w3, b3 = lin(keys[4], keys[5], H2, D_OUT)
    return (w1, b1, w2, b2, w3, b3)


def policy_forward_ref(x, params):
    """Plain-JAX reference mirroring the PyTorch forward (softmax over dim=0)."""
    w1, b1, w2, b2, w3, b3 = params
    h1 = jnp.maximum(x @ w1.T + b1, 0.0)
    h2 = jnp.maximum(h1 @ w2.T + b2, 0.0)
    s = h2 @ w3.T + b3
    return jax.nn.softmax(s, axis=0)


if __name__ == "__main__":
    key = jax.random.PRNGKey(0)
    k_params, k_x = jax.random.split(key)

    params = init_params(k_params)
    slab = pack_params(*params)
    x = jax.random.normal(k_x, (2, D_IN), jnp.float32)   # batch=2, state dim=16

    out = policy_forward(x, slab)
    out = jax.block_until_ready(out)

    ref = policy_forward_ref(x, params)
    assert out.shape == (2, D_OUT)
    # approx=True reciprocal (EUP) is ~1e-4 relative error -> loosened tolerance.
    assert jnp.allclose(out, ref, atol=2e-3, rtol=2e-3)

    print("KERNEL_OK")
</pallas_src>

<mosaic_0001>
module attributes {stable_mosaic.version = 11 : i64} {
  func.func @policy_kernel(%arg0: i32, %arg1: i32, %arg2: memref<16x128xf32, #tpu.memory_space<vmem>>, %arg3: memref<104x128xf32, #tpu.memory_space<vmem>>, %arg4: memref<6x128xf32, #tpu.memory_space<vmem>>, %arg5: memref<6x1xf32, #tpu.memory_space<vmem>>, %arg6: memref<6x1xf32, #tpu.memory_space<vmem>>) attributes {dimension_semantics = [#tpu.dimension_semantics<arbitrary>, #tpu.dimension_semantics<arbitrary>], iteration_bounds = array<i64: 2, 1>, scalar_prefetch = 0 : i64, scratch_operands = 2 : i64, tpu.core_type = #tpu.core_type<tc>, window_params = [{transform_indices = @transform_0, window_bounds = array<i64: 16, 128>}, {pipeline_mode = #tpu.pipeline_mode<synchronous>, transform_indices = @transform_1, window_bounds = array<i64: 104, 128>}, {transform_indices = @transform_2, window_bounds = array<i64: 6, 128>}]} {
    %c0 = arith.constant 0 : index
    %c0_0 = arith.constant 0 : index
    %0 = vector.load %arg3[%c0, %c0_0] : memref<104x128xf32, #tpu.memory_space<vmem>>, vector<64x16xf32>
    %c0_1 = arith.constant 0 : index
    %c16 = arith.constant 16 : index
    %1 = vector.load %arg3[%c0_1, %c16] : memref<104x128xf32, #tpu.memory_space<vmem>>, vector<64x1xf32>
    %c64 = arith.constant 64 : index
    %c0_2 = arith.constant 0 : index
    %2 = vector.load %arg3[%c64, %c0_2] : memref<104x128xf32, #tpu.memory_space<vmem>>, vector<32x64xf32>
    %c64_3 = arith.constant 64 : index
    %c64_4 = arith.constant 64 : index
    %3 = vector.load %arg3[%c64_3, %c64_4] : memref<104x128xf32, #tpu.memory_space<vmem>>, vector<32x1xf32>
    %c96 = arith.constant 96 : index
    %c0_5 = arith.constant 0 : index
    %4 = vector.load %arg3[%c96, %c0_5] : memref<104x128xf32, #tpu.memory_space<vmem>>, vector<6x32xf32>
    %c96_6 = arith.constant 96 : index
    %c32 = arith.constant 32 : index
    %5 = vector.load %arg3[%c96_6, %c32] : memref<104x128xf32, #tpu.memory_space<vmem>>, vector<6x1xf32>
    %c0_7 = arith.constant 0 : index
    %c0_8 = arith.constant 0 : index
    %6 = vector.load %arg2[%c0_7, %c0_8] : memref<16x128xf32, #tpu.memory_space<vmem>>, vector<16x128xf32>
    %cst = arith.constant dense<0.000000e+00> : vector<64x128xf32>
    %7 = tpu.matmul %0, %6, %cst {dimension_numbers = #tpu.dot_dimension_numbers<[1], [0], [0], [1], [0, 0, 1, 1], [], []>} : vector<64x16xf32>, vector<16x128xf32>, vector<64x128xf32> -> vector<64x128xf32>
    %8 = vector.broadcast %1 : vector<64x1xf32> to vector<64x128xf32>
    %9 = arith.addf %7, %8 : vector<64x128xf32>
    %cst_9 = arith.constant 0.000000e+00 : f32
    %10 = vector.broadcast %cst_9 : f32 to vector<64x128xf32>
    %11 = arith.maximumf %9, %10 : vector<64x128xf32>
    %cst_10 = arith.constant dense<0.000000e+00> : vector<32x128xf32>
    %12 = tpu.matmul %2, %11, %cst_10 {dimension_numbers = #tpu.dot_dimension_numbers<[1], [0], [0], [1], [0, 0, 1, 1], [], []>} : vector<32x64xf32>, vector<64x128xf32>, vector<32x128xf32> -> vector<32x128xf32>
    %13 = vector.broadcast %3 : vector<32x1xf32> to vector<32x128xf32>
    %14 = arith.addf %12, %13 : vector<32x128xf32>
    %cst_11 = arith.constant 0.000000e+00 : f32
    %15 = vector.broadcast %cst_11 : f32 to vector<32x128xf32>
    %16 = arith.maximumf %14, %15 : vector<32x128xf32>
    %cst_12 = arith.constant dense<0.000000e+00> : vector<6x128xf32>
    %17 = tpu.matmul %4, %16, %cst_12 {dimension_numbers = #tpu.dot_dimension_numbers<[1], [0], [0], [1], [0, 0, 1, 1], [], []>} : vector<6x32xf32>, vector<32x128xf32>, vector<6x128xf32> -> vector<6x128xf32>
    %18 = vector.broadcast %5 : vector<6x1xf32> to vector<6x128xf32>
    %19 = arith.addf %17, %18 : vector<6x128xf32>
    %20 = tpu.iota {dimensions = array<i32: 1>} : vector<6x128xi32>
    %c128_i32 = arith.constant 128 : i32
    %21 = arith.muli %arg1, %c128_i32 : i32
    %22 = vector.broadcast %21 : i32 to vector<6x128xi32>
    %23 = arith.addi %22, %20 : vector<6x128xi32>
    %c2_i32 = arith.constant 2 : i32
    %24 = vector.broadcast %c2_i32 : i32 to vector<6x128xi32>
    %25 = arith.cmpi slt, %23, %24 : vector<6x128xi32>
    %cst_13 = arith.constant 0xFF800000 : f32
    %26 = vector.broadcast %cst_13 : f32 to vector<6x128xf32>
    %27 = arith.select %25, %19, %26 : vector<6x128xi1>, vector<6x128xf32>
    %c0_i32 = arith.constant 0 : i32
    %28 = arith.cmpi eq, %arg0, %c0_i32 : i32
    %c0_i32_14 = arith.constant 0 : i32
    %29 = arith.cmpi eq, %arg1, %c0_i32_14 : i32
    %30 = arith.andi %28, %29 : i1
    %31 = arith.extui %30 : i1 to i32
    %cst_15 = arith.constant 0xFF800000 : f32
    %c0_i32_16 = arith.constant 0 : i32
    %32 = arith.cmpi ne, %31, %c0_i32_16 : i32
    scf.if %32 {
      %39 = vector.broadcast %cst_15 : f32 to vector<6x1xf32>
      %c0_20 = arith.constant 0 : index
      %c0_21 = arith.constant 0 : index
      %40 = vector.load %arg5[%c0_20, %c0_21] : memref<6x1xf32, #tpu.memory_space<vmem>>, vector<6x1xf32>
      tpu.vector_store %arg5[%c0_20, %c0_21], %39 {strides = array<i32>} : memref<6x1xf32, #tpu.memory_space<vmem>>, vector<6x1xf32>,
      %cst_22 = arith.constant 0.000000e+00 : f32
      %41 = vector.broadcast %cst_22 : f32 to vector<6x1xf32>
      %c0_23 = arith.constant 0 : index
      %c0_24 = arith.constant 0 : index
      %42 = vector.load %arg6[%c0_23, %c0_24] : memref<6x1xf32, #tpu.memory_space<vmem>>, vector<6x1xf32>
      tpu.vector_store %arg6[%c0_23, %c0_24], %41 {strides = array<i32>} : memref<6x1xf32, #tpu.memory_space<vmem>>, vector<6x1xf32>,
    } else {
    }
    %c0_i32_17 = arith.constant 0 : i32
    %33 = arith.cmpi eq, %arg0, %c0_i32_17 : i32
    %34 = arith.extui %33 : i1 to i32
    %c0_i32_18 = arith.constant 0 : i32
    %35 = arith.cmpi ne, %34, %c0_i32_18 : i32
    scf.if %35 {
      %c0_20 = arith.constant 0 : index
      %c0_21 = arith.constant 0 : index
      %39 = vector.load %arg5[%c0_20, %c0_21] : memref<6x1xf32, #tpu.memory_space<vmem>>, vector<6x1xf32>
      %cst_22 = arith.constant dense<0xFF800000> : vector<6xf32>
      %40 = vector.multi_reduction <maximumf>, %27, %cst_22 [1] : vector<6x128xf32> to vector<6xf32>
      %41 = vector.shape_cast %40 : vector<6xf32> to vector<6x1xf32>
      %42 = arith.maximumf %39, %41 : vector<6x1xf32>
      %c0_23 = arith.constant 0 : index
      %c0_24 = arith.constant 0 : index
      %43 = vector.load %arg6[%c0_23, %c0_24] : memref<6x1xf32, #tpu.memory_space<vmem>>, vector<6x1xf32>
      %44 = arith.subf %39, %42 : vector<6x1xf32>
      %45 = math.exp %44 : vector<6x1xf32>
      %46 = arith.mulf %43, %45 : vector<6x1xf32>
      %47 = vector.broadcast %42 : vector<6x1xf32> to vector<6x128xf32>
      %48 = arith.subf %27, %47 : vector<6x128xf32>
      %49 = math.exp %48 : vector<6x128xf32>
      %cst_25 = arith.constant dense<0.000000e+00> : vector<6xf32>
      %50 = vector.multi_reduction <add>, %49, %cst_25 [1] : vector<6x128xf32> to vector<6xf32>
      %51 = vector.shape_cast %50 : vector<6xf32> to vector<6x1xf32>
      %52 = arith.addf %46, %51 : vector<6x1xf32>
      %c0_26 = arith.constant 0 : index
      %c0_27 = arith.constant 0 : index
      %53 = vector.load %arg6[%c0_26, %c0_27] : memref<6x1xf32, #tpu.memory_space<vmem>>, vector<6x1xf32>
      tpu.vector_store %arg6[%c0_26, %c0_27], %52 {strides = array<i32>} : memref<6x1xf32, #tpu.memory_space<vmem>>, vector<6x1xf32>,
      %c0_28 = arith.constant 0 : index
      %c0_29 = arith.constant 0 : index
      %54 = vector.load %arg5[%c0_28, %c0_29] : memref<6x1xf32, #tpu.memory_space<vmem>>, vector<6x1xf32>
      tpu.vector_store %arg5[%c0_28, %c0_29], %42 {strides = array<i32>} : memref<6x1xf32, #tpu.memory_space<vmem>>, vector<6x1xf32>,
    } else {
    }
    %c1_i32 = arith.constant 1 : i32
    %36 = arith.cmpi eq, %arg0, %c1_i32 : i32
    %37 = arith.extui %36 : i1 to i32
    %c0_i32_19 = arith.constant 0 : i32
    %38 = arith.cmpi ne, %37, %c0_i32_19 : i32
    scf.if %38 {
      %c0_20 = arith.constant 0 : index
      %c0_21 = arith.constant 0 : index
      %39 = vector.load %arg6[%c0_20, %c0_21] : memref<6x1xf32, #tpu.memory_space<vmem>>, vector<6x1xf32>
      %40 = tpu.reciprocal %39 {approx = true} : vector<6x1xf32> -> vector<6x1xf32>
      %c0_22 = arith.constant 0 : index
      %c0_23 = arith.constant 0 : index
      %41 = vector.load %arg5[%c0_22, %c0_23] : memref<6x1xf32, #tpu.memory_space<vmem>>, vector<6x1xf32>
      %42 = vector.broadcast %41 : vector<6x1xf32> to vector<6x128xf32>
      %43 = arith.subf %27, %42 : vector<6x128xf32>
      %44 = math.exp %43 : vector<6x128xf32>
      %45 = vector.broadcast %40 : vector<6x1xf32> to vector<6x128xf32>
      %46 = arith.mulf %44, %45 : vector<6x128xf32>
      %c0_24 = arith.constant 0 : index
      %c0_25 = arith.constant 0 : index
      %47 = vector.load %arg4[%c0_24, %c0_25] : memref<6x128xf32, #tpu.memory_space<vmem>>, vector<6x128xf32>
      tpu.vector_store %arg4[%c0_24, %c0_25], %46 {strides = array<i32>} : memref<6x128xf32, #tpu.memory_space<vmem>>, vector<6x128xf32>,
    } else {
    }
    return
  }
  func.func @transform_0(%arg0: i32, %arg1: i32) -> (i32, i32) {
    %c0_i32 = arith.constant 0 : i32
    %c0_i32_0 = arith.constant 0 : i32
    return %c0_i32, %arg1 : i32, i32
  }
  func.func @transform_1(%arg0: i32, %arg1: i32) -> (i32, i32) {
    %c0_i32 = arith.constant 0 : i32
    %c0_i32_0 = arith.constant 0 : i32
    %c0_i32_1 = arith.constant 0 : i32
    return %c0_i32, %c0_i32_0 : i32, i32
  }
  func.func @transform_2(%arg0: i32, %arg1: i32) -> (i32, i32) {
    %c0_i32 = arith.constant 0 : i32
    %c0_i32_0 = arith.constant 0 : i32
    return %c0_i32, %arg1 : i32, i32
  }
}

</mosaic_0001>

<bundles_post_ra>
// kernel: tpu_custom_call.1
= control target key start
LH: loop header
LB: loop body
LE: loop exit
PB: predicated region body
PF: predicated region fallthrough
CT: control target
= control target key end

     0   :  { %7 = vsyncpa [#allocation5], 0  ;;  %s1195_s0 = inlined_call_operand.hbm [shape: f32[16,128], index: 0, kind: input, shape index: {}]   ;;  %s1196_s1 = inlined_call_operand.hbm [shape: f32[104,128], index: 1, kind: input, shape index: {}]   ;;  %s1197_s2 = inlined_call_operand.hbm [shape: f32[6,128], index: 2, kind: output, shape index: {}]  }
   0x1   :  { %8 = vsyncpa [#allocation8], 0 }
   0x2   :  { %9 = vsyncpa [#allocation6], 0  ;;  %s1041_s9 = smov 0   ;;  %s1043_s10 = smov 0  }
   0x3   :  { %s1045_s11 = smov 0  }
   0x4 LB: > { %s683_s12 = sadd.s32 4294967295, %s1009_s11   ;;  %s27_s13 = sadd.s32 1, %s1005_s10  ;;  %s1009_s11 = sphi %s1045_s11, %s15_s11   ;;  %s1005_s10 = sphi %s1043_s10, %s1208_s10   ;;  %s1001_s9 = sphi %s1041_s9, %s1207_s9  }
   0x5   : > { %p29_p0 = scmp.ge.s32.totalorder %s27_s13, 2  ;;  %p684_p1 = scmp.ge.s32.totalorder %s1009_s11, 1 }
   0x6   : > { %p105_p2 = scmp.lt.s32.totalorder %s1009_s11, 3  ;;  %p1068_p4 = scmp.eq.s32.totalorder %s683_s12, 0 }
   0x7   : > { %s1210_s13 = smov (%p29_p0, %s27_s13), 0  ;;  %s1011_s16 = smov [#allocation4]  }
   0x8   : > { %p1062_p3 = pnand %p684_p1, %p105_p2  ;;  %s119_s17 = sshll.u32 %s1011_s16, 4  ;;  %s120_s17 = int_to_ptr.vmem [resolvable:$true] %s119_s17 }
   0x9   : > { %s1202_s15 = scalar_select %p1068_p4, 1, 0 }
   0xa   : > { %s1201_s14 = scalar_select %p1062_p3, 1, 0 }
   0xb   : > { %p825_p5 = pneg %p1062_p3  ;;  %s1012_s19 = smov [#allocation7]  }
   0xc   : > { %s132_s20 = sshll.u32 %s1012_s19, 4  ;;  %s893_s23 = scalar_lea.hbm %s1195_s0, 256  ;;  %s1080_s20 = int_to_ptr.vmem [resolvable:$true] %s132_s20 }
   0xd   : > { %p1076_p6 = pnand %p1068_p4, %p825_p5  ;;  %p894_p7 = scmp.ne.s32.totalorder %s1195_s0, %s893_s23 }
   0xe   : > { %p900_p11 = scmp.lt.u32.totalorder %s893_s23, %s1195_s0 }
   0xf   : > { %p895_p8 = pneg %p1076_p6 }
  0x11   : > { %p896_p9 = pnand %p895_p8, %p894_p7 }
  0x13   : > { %p897_p10 = pneg %p896_p9 }
  0x15   : > { %p902_p12 = pnand %p900_p11, %p897_p10 }
  0x17   : > { %905 = shalt.err (!%p902_p12)
}
  0x18   : > { %s906_s28 = scalar_lea.vmem %s120_s17, 256  ;;  %p914_p2 = scmp.lt.s32.totalorder %s120_s17, %s120_s17 }
  0x19   : > { %p907_p13 = scmp.ne.s32.totalorder %s120_s17, %s906_s28  ;;  %p915_p5 = scmp.lt.s32.totalorder %s906_s28, %s906_s28 }
  0x1b   : > { %p909_p0 = pnand %p907_p13, %p895_p8  ;;  %p916_p4 = por %p915_p5, %p914_p2 }
  0x1d   : > { %p910_p1 = pneg %p909_p0 }
  0x1f   : > { %p917_p3 = pnand %p916_p4, %p910_p1 }
  0x21   : > { %920 = shalt.err (!%p917_p3)
}
  0x22   : > { %s1013_s29 = smov 128   ;;  %s1014_s30 = smov 8  }
  0x23   : > { %828 = dma.hbm_to_vmem [thread:$0]  (!%p1076_p6), %s1195_s0, 256, %s120_s17, [#allocation5], %s1013_s29, %s1013_s29, %s1014_s30  }
  0x24   : > { %s921_s7 = scalar_lea.hbm %s1196_s1, 1664 }
  0x25   : > { %p922_p7 = scmp.ne.s32.totalorder %s1196_s1, %s921_s7  ;;  %p928_p9 = scmp.lt.u32.totalorder %s921_s7, %s1196_s1 }
  0x27   : > { %p924_p3 = pnand %p922_p7, %p895_p8 }
  0x29   : > { %p925_p4 = pneg %p924_p3 }
  0x2b   : > { %p930_p10 = pnand %p928_p9, %p925_p4 }
  0x2d   : > { %933 = shalt.err (!%p930_p10)
}
  0x2e   : > { %s934_s17 = scalar_lea.vmem %s1080_s20, 1664  ;;  %p942_p0 = scmp.lt.s32.totalorder %s1080_s20, %s1080_s20 }
  0x2f   : > { %p935_p11 = scmp.ne.s32.totalorder %s1080_s20, %s934_s17  ;;  %p943_p1 = scmp.lt.s32.totalorder %s934_s17, %s934_s17 }
  0x31   : > { %p937_p12 = pnand %p935_p11, %p895_p8  ;;  %p944_p2 = por %p943_p1, %p942_p0 }
  0x33   : > { %p938_p13 = pneg %p937_p12 }
  0x35   : > { %p945_p5 = pnand %p944_p2, %p938_p13 }
  0x37   : > { %948 = shalt.err (!%p945_p5)
}
  0x38   : > { %831 = dma.hbm_to_vmem [thread:$0]  (!%p1076_p6), %s1196_s1, 1664, %s1080_s20, [#allocation8], %s1013_s29, %s1013_s29, %s1014_s30  }
  0x39   : > { %p1204_p7 = scmp.ne.s32.totalorder %s1201_s14, 0 }
  0x3a   : > { %p1205_p3 = scmp.ne.s32.totalorder (!%p1204_p7), %s1202_s15, 0 }
  0x3b   : > { %148 = sbr.rel (%p1204_p7) target bundleno = 1362 (0x552), region = 28 }
  0x42   : > { %988 = dma.done.wait (%p1205_p3), [#allocation5], 256  }
  0x43   : > { %990 = vsyncadd (%p1205_p3), [#allocation5], 4294967040 }
  0x44   : > { %992 = dma.done.wait (%p1205_p3), [#allocation8], 1664  }
  0x45   : > { %994 = vsyncadd (%p1205_p3), [#allocation8], 4294965632  ;;  %v1015_v0 = vmov 16   ;;  %vm219_vm0 = vcmask 130048   ;;  %v177_v1 = vld [vmem:[#allocation4] sm:$0xff]  ;;  %v178_v2 = vld [vmem:[#allocation4 + $0x8] sm:$0xff] }
  0x46   : > { %877 = vset.pattern.permute.xlu0 %v1015_v0  ;;  %878 = vset.pattern.permute.xlu1 %v1015_v0  ;;  %v164_v3 = vld [vmem:[#allocation7] sm:$0xff]  ;;  %v787_v4 = vpack.c.bf16 %v178_v2, %v177_v1  ;;  %v166_v5 = vld [vmem:[#allocation7 + $0x10] sm:$0xff]  ;;  %v165_v6 = vld [vmem:[#allocation7 + $0x8] sm:$0xff]  ;;  %vm369_vm1 = vcmask 523264   ;;  %v1016_v14 = vmov 64   ;;  %v1017_v53 = vmov 0.0|0.0  }
  0x47   : > { %742 = vmatprep.mubr.msk.f32.mxu0 %vm219_vm0, %v164_v3  ;;  %181 = vperm.xlu0 %877, %v164_v3   ;;  %v167_v7 = vld [vmem:[#allocation7 + $0x18] sm:$0xff]  ;;  %v168_v8 = vld [vmem:[#allocation7 + $0x20] sm:$0xff]  ;;  %v169_v9 = vld [vmem:[#allocation7 + $0x28] sm:$0xff]  ;;  %vm1018_vm2 = vmmov 0   ;;  %v1019_v54 = vmov 0.0   ;;  %v1020_v56 = vmov 32  }
  0x48   : > { %191 = vperm.xlu1 %878, %v166_v5   ;;  %788 = vmatprep.subr.bf16.mxu0 %v787_v4  ;;  %v170_v10 = vld [vmem:[#allocation7 + $0x30] sm:$0xff]  ;;  %v171_v11 = vld [vmem:[#allocation7 + $0x38] sm:$0xff]  ;;  %v172_v12 = vld [vmem:[#allocation7 + $0x40] sm:$0xff]  ;;  %vm472_vm3 = vcmask 261120   ;;  %p552_p6 = scmp.eq.s32.totalorder %s1001_s9, 0 }
  0x49   : > { %790 = vmatpush3.bf16.msra.mxu0 %v787_v4  ;;  %770 = vmatprep.mubr.msk.f32.mxu1 %vm369_vm1, %v172_v12  ;;  %v173_v13 = vld [vmem:[#allocation7 + $0x48] sm:$0xff]  ;;  %v174_v15 = vld [vmem:[#allocation7 + $0x50] sm:$0xff]  ;;  %v175_v16 = vld [vmem:[#allocation7 + $0x58] sm:$0xff]  ;;  %vm558_vm5 = vcmask (%p552_p6), 5120  }
  0x4a   : > { %807 = vmatprep.subr.bf16.mxu0 %v1017_v53  ;;  %v176_v55 = vld [vmem:[#allocation7 + $0x60] sm:$0x3f] }
  0x4b   : > { %186 = vperm.xlu0 %877, %v165_v6  }
  0x4c   : > { %196 = vperm.xlu1 %878, %v167_v7   ;;  %743 = vmatmul.mubr.msk.f32.vlgmr.msra.gmra.mrb[0].mxu0 %vm219_vm0, %v165_v6 }
  0x4d   : > { %745 = vmatprep.mubr.msk.f32.mxu0 %vm219_vm0, %v166_v5 }
  0x4f   : > { %201 = vperm.xlu0 %877, %v168_v8  }
  0x50   : > { %206 = vperm.xlu1 %878, %v169_v9   ;;  %746 = vmatmul.mubr.msk.f32.gmra.mrb[2].mxu0 %vm219_vm0, %v167_v7 }
  0x51   : > { %748 = vmatprep.mubr.msk.f32.mxu0 %vm219_vm0, %v168_v8 }
  0x53   : > { %211 = vperm.xlu0 %877, %v170_v10  }
  0x54   : > { %216 = vperm.xlu1 %878, %v171_v11   ;;  %749 = vmatmul.mubr.msk.f32.gmra.mrb[4].mxu0 %vm219_vm0, %v169_v9 }
  0x55   : > { %751 = vmatprep.mubr.msk.f32.mxu0 %vm219_vm0, %v170_v10 }
  0x57   : > { %879 = vset.pattern.permute.xlu0 %v1016_v14 }
  0x58   : > { %752 = vmatmul.mubr.msk.f32.gmra.mrb[6].mxu0 %vm219_vm0, %v171_v11  ;;  %880 = vset.pattern.permute.xlu1 %v1016_v14  ;;  %v545_v11 = vlaneseq }
  0x59   : > { %356 = vperm.xlu1 %880, %v173_v13   ;;  %351 = vperm.xlu0 %879, %v172_v12  }
  0x5a   : > { %784 = vmatprep.mubr.msk.f32.mxu0 %vm1018_vm2, %v1019_v54  ;;  %v546_v12 = vand.u32 127, %v545_v11 }
  0x5c   : > { %vm550_vm4 = vcmp.lt.s32.totalorder %v546_v12, 2 }
  0x5d   : > { %361 = vperm.xlu1 %880, %v174_v15   ;;  %366 = vperm.xlu0 %879, %v175_v16  }
  0x61   : > { %881 = vset.pattern.permute.xlu1 %v1020_v56  ;;  %882 = vset.pattern.permute.xlu0 %v1020_v56 }
  0x62   : > { %469 = vperm.xlu1 %881, %v176_v55  }
  0xc6   : > { %v182_v17 = vpop.permute.xlu0 %181 }
  0xc7   : > { %v192_v18 = vpop.permute.xlu1 %191 }
  0xca   : > { %v187_v19 = vpop.permute.xlu0 %186 }
  0xcb   : > { %v197_v20 = vpop.permute.xlu1 %196 }
  0xce   : > { %v202_v33 = vpop.permute.xlu0 %201 }
  0xcf   : > { %v207_v30 = vpop.permute.xlu1 %206 }
  0xd2   : > { %v212_v45 = vpop.permute.xlu0 %211 }
  0xd3   : > { %v217_v42 = vpop.permute.xlu1 %216 }
  0xd8   : > { %v352_v57 = vpop.permute.xlu0 %351  ;;  %v357_v58 = vpop.permute.xlu1 %356 }
  0xdc   : > { %v367_v0 = vpop.permute.xlu0 %366  ;;  %v362_v3 = vpop.permute.xlu1 %361 }
 0x11f   : > { %v744_v21 = vpop.f32.mrb[0].mxu0 }
 0x120   : > { %v308_v22 = vadd.f32 %v744_v21, %v187_v19  ;;  %v302_v23 = vpop.f32.mrb[1].mxu0  ;;  %v1022_v19 = vmov (%p552_p6), 0.0  }
 0x121   : > { %v303_v24 = vadd.f32 %v302_v23, %v182_v17  ;;  %560 = vst.msk [vmem:[#allocation3] sm:$0x3f] (%p552_p6), %vm558_vm5, %v1022_v19 }
 0x122   : > { %v342_v25 = vmax.f32 %v308_v22, 0.0 }
 0x123   : > { %v341_v26 = vmax.f32 %v303_v24, 0.0  ;;  %v747_v27 = vpop.f32.mrb[2].mxu0 }
 0x124   : > { %v318_v28 = vadd.f32 %v747_v27, %v197_v20  ;;  %v312_v29 = vpop.f32.mrb[3].mxu0 }
 0x125   : > { %v313_v31 = vadd.f32 %v312_v29, %v192_v18  ;;  %v791_v32 = vpack.c.bf16 %v342_v25, %v341_v26  ;;  %v1021_v18 = vmov (%p552_p6), -inf  }
 0x126   : > { %v344_v34 = vmax.f32 %v318_v28, 0.0  ;;  %559 = vst.msk [vmem:[#allocation2] sm:$0x3f] (%p552_p6), %vm558_vm5, %v1021_v18 }
 0x127   : > { %v343_v35 = vmax.f32 %v313_v31, 0.0  ;;  %v750_v36 = vpop.f32.mrb[4].mxu0  ;;  %792 = vmatprep.subr.bf16.mxu1 %v791_v32 }
 0x128   : > { %v328_v37 = vadd.f32 %v750_v36, %v207_v30  ;;  %v322_v38 = vpop.f32.mrb[5].mxu0  ;;  %794 = vmatpush3.bf16.msra.mxu1 %v791_v32 }
 0x129   : > { %v795_v39 = vpack.c.bf16 %v344_v34, %v343_v35  ;;  %v323_v40 = vadd.f32 %v322_v38, %v202_v33 }
 0x12a   : > { %v346_v41 = vmax.f32 %v328_v37, 0.0 }
 0x12b   : > { %v345_v43 = vmax.f32 %v323_v40, 0.0  ;;  %v753_v44 = vpop.f32.mrb[6].mxu0  ;;  %796 = vmatprep.subr.bf16.mxu1 %v795_v39 }
 0x12c   : > { %v338_v46 = vadd.f32 %v753_v44, %v217_v42  ;;  %v332_v47 = vpop.f32.mrb[7].mxu0  ;;  %798 = vmatpush3.bf16.msra.mxu1 %v795_v39 }
 0x12d   : > { %v799_v48 = vpack.c.bf16 %v346_v41, %v345_v43  ;;  %v333_v49 = vadd.f32 %v332_v47, %v212_v45 }
 0x12e   : > { %v348_v50 = vmax.f32 %v338_v46, 0.0 }
 0x12f   : > { %v347_v51 = vmax.f32 %v333_v49, 0.0  ;;  %800 = vmatprep.subr.bf16.mxu1 %v799_v48 }
 0x130   : > { %802 = vmatpush3.bf16.msra.mxu1 %v799_v48 }
 0x131   : > { %v803_v52 = vpack.c.bf16 %v348_v50, %v347_v51 }
 0x133   : > { %804 = vmatprep.subr.bf16.mxu1 %v803_v52 }
 0x134   : > { %806 = vmatpush3.bf16.msra.mxu1 %v803_v52 }
 0x137   : > { %771 = vmatmul.mubr.msk.f32.vlgmr.msra.gmra.mrb[0].mxu1 %vm369_vm1, %v173_v13  ;;  %v470_v13 = vpop.permute.xlu1 %469 }
 0x138   : > { %773 = vmatprep.mubr.msk.f32.mxu1 %vm369_vm1, %v174_v15 }
 0x13b   : > { %774 = vmatmul.mubr.msk.f32.gmra.mrb[2].mxu1 %vm369_vm1, %v175_v16 }
 0x20a   : > { %v772_v59 = vpop.f32.mrb[0].mxu1 }
 0x20b   : > { %v450_v60 = vadd.f32 %v772_v59, %v357_v58  ;;  %v444_v61 = vpop.f32.mrb[1].mxu1 }
 0x20c   : > { %v445_v62 = vadd.f32 %v444_v61, %v352_v57 }
 0x20d   : > { %v464_v63 = vmax.f32 %v450_v60, 0.0 }
 0x20e   : > { %v463_v1 = vmax.f32 %v445_v62, 0.0  ;;  %v775_v2 = vpop.f32.mrb[2].mxu1 }
 0x20f   : > { %v460_v4 = vadd.f32 %v775_v2, %v367_v0  ;;  %v454_v5 = vpop.f32.mrb[3].mxu1 }
 0x210   : > { %v808_v6 = vpack.c.bf16 %v464_v63, %v463_v1  ;;  %v455_v7 = vadd.f32 %v454_v5, %v362_v3 }
 0x211   : > { %v466_v8 = vmax.f32 %v460_v4, 0.0 }
 0x212   : > { %v465_v9 = vmax.f32 %v455_v7, 0.0  ;;  %809 = vmatpush3.bf16.msra.mxu0 %v808_v6 }
 0x213   : > { %810 = vmatprep.subr.bf16.mxu0 %v1017_v53 }
 0x214   : > { %v811_v10 = vpack.c.bf16 %v466_v8, %v465_v9 }
 0x216   : > { %812 = vmatpush3.bf16.msra.mxu0 %v811_v10 }
 0x219   : > { %785 = vmatmul.mubr.msk.f32.vlgmr.msra.gmra.mrb[8].mxu0 %vm472_vm3, %v176_v55 }
 0x2e9   : > { %557 = sbr.rel (!%p552_p6) target bundleno = 752 (0x2f0), region = 40 }
 0x2ec   : > { %v541_v14 = vpop.f32.mrb[8].mxu0 }
 0x2ed   : > { %v542_v15 = vadd.f32 %v541_v14, %v470_v13  ;;  %v786_v16 = vpop.f32.mrb[9].mxu0 }
 0x2ef   : > { %v551_v17 = vsel %vm550_vm4, %v542_v15, -inf }
 0x2f0 PF: > { %p704_p8 = scmp.ne.s32.totalorder %s1001_s9, 0 }
 0x2f1   : > { %vm565_vm6 = vcmask (!%p704_p8), 1045504   ;;  %v1023_v21 = vmov (!%p704_p8), 0   ;;  %v564_v22 = vld [vmem:[#allocation2] sm:$0x3f] (!%p704_p8)  ;;  %vm587_vm7 = vcmask (!%p704_p8), 5120  }
 0x2f2   : > { %563 = sbr.rel (%p704_p8) target bundleno = 1188 (0x4a4), region = 44  ;;  %v566_v20 = vsel (!%p704_p8), %vm565_vm6, %v551_v17, -inf  ;;  %883 = vset.pattern.permute.xlu0 (!%p704_p8), %v1023_v21  ;;  %v570_v33 = vld [vmem:[#allocation3] sm:$0x3f] (!%p704_p8) }
 0x2f3   : > { %567 = vmax.xlane.f32.xlu0 (!%p704_p8), %v566_v20 }
 0x380   : > { %v568_v23 = vpop.xlane.xlu0 %567 }
 0x381   : > { %v569_v24 = vmax.f32 %v564_v22, %v568_v23 }
 0x383   : > { %v571_v25 = vsub.f32 %v564_v22, %v569_v24  ;;  %589 = vst.msk [vmem:[#allocation2] sm:$0x3f] %vm587_vm7, %v569_v24  ;;  %577 = vperm.xlu0 %883, %v569_v24  }
 0x385   : > { %v572_v31 = vmul.f32 1.442695, %v571_v25 }
 0x402   : > { %v578_v26 = vpop.permute.xlu0 %577 }
 0x403   : > { %v580_v27 = vsub.f32 %v551_v17, %v578_v26 }
 0x405   : > { %v581_v28 = vmul.f32 1.442695, %v580_v27 }
 0x407   : > { %884 = vpow2.f32 %v581_v28 }
 0x408   : > { %886 = vpow2.f32 %v572_v31 }
 0x411   : > { %v885_v29 = vpop.eup %884 }
 0x412   : > { %v583_v30 = vsel %vm565_vm6, %v885_v29, 0.0  ;;  %v887_v32 = vpop.eup %886 }
 0x413   : > { %584 = vadd.xlane.f32.xlu1 %v583_v30  ;;  %v574_v34 = vmul.f32 %v887_v32, %v570_v33 }
 0x4a0   : > { %v585_v35 = vpop.xlane.xlu1 %584 }
 0x4a1   : > { %v586_v36 = vadd.f32 %v585_v35, %v574_v34 }
 0x4a3   : > { %588 = vst.msk [vmem:[#allocation3] sm:$0x3f] %vm587_vm7, %v586_v36 }
 0x4a4 PF: > { %p705_p4 = scmp.ne.s32.totalorder %s1001_s9, 1 }
 0x4a5   : > { %v596_v37 = vld [vmem:[#allocation2] sm:$0x3f] (!%p705_p4)  ;;  %v1024_v39 = vmov (!%p705_p4), 0  }
 0x4a6   : > { %593 = sbr.rel (%p705_p4) target bundleno = 1337 (0x539), region = 48  ;;  %888 = vset.pattern.permute.xlu0 (!%p705_p4), %v1024_v39 }
 0x4a7   : > { %599 = vperm.xlu0 (!%p705_p4), %888, %v596_v37  }
 0x4aa   : > { %v594_v38 = vld [vmem:[#allocation3] sm:$0x3f] (!%p705_p4) }
 0x4ab   : > { %889 = vrcp.f32 (!%p705_p4), %v594_v38 }
 0x4b5   : > { %v890_v40 = vpop.eup %889 }
 0x4b6   : > { %607 = vperm.xlu0 %888, %v890_v40  }
 0x526   : > { %v600_v41 = vpop.permute.xlu0 %599 }
 0x527   : > { %v602_v42 = vsub.f32 %v551_v17, %v600_v41 }
 0x529   : > { %v603_v43 = vmul.f32 1.442695, %v602_v42 }
 0x52b   : > { %891 = vpow2.f32 %v603_v43 }
 0x535   : > { %v892_v44 = vpop.eup %891  ;;  %v608_v45 = vpop.permute.xlu0 %607 }
 0x536   : > { %v610_v46 = vmul.f32 %v892_v44, %v608_v45 }
 0x538   : > { %611 = vst [vmem:[#allocation9] sm:$0x3f] %v610_v46 }
 0x539 PF: > { %p1160_p9 = scmp.eq.s32.totalorder %s683_s12, 1  ;;  %s1025_s14 = smov [#allocation9]  }
 0x53a   : > { %s621_s15 = sshll.u32 %s1025_s14, 4  ;;  %s622_s15 = int_to_ptr.vmem [resolvable:$true] %s621_s15 }
 0x53b   : > { %s949_s18 = scalar_lea.vmem %s622_s15, 128  ;;  %p956_p13 = scmp.lt.s32.totalorder %s622_s15, %s622_s15 }
 0x53c   : > { %p950_p10 = scmp.ne.s32.totalorder %s622_s15, %s949_s18  ;;  %p957_p0 = scmp.lt.s32.totalorder %s949_s18, %s949_s18 }
 0x53e   : > { %p951_p11 = pnand %p950_p10, %p1160_p9  ;;  %p958_p1 = por %p957_p0, %p956_p13 }
 0x540   : > { %p952_p12 = pneg %p951_p11 }
 0x542   : > { %p959_p2 = pnand %p958_p1, %p952_p12 }
 0x544   : > { %962 = shalt.err (!%p959_p2)
}
 0x545   : > { %s963_s12 = scalar_lea.hbm %s1197_s2, 128 }
 0x546   : > { %p964_p5 = scmp.ne.s32.totalorder %s1197_s2, %s963_s12  ;;  %p969_p6 = scmp.lt.u32.totalorder %s963_s12, %s1197_s2 }
 0x548   : > { %p965_p7 = pnand %p964_p5, %p1160_p9 }
 0x54a   : > { %p966_p3 = pneg %p965_p7 }
 0x54c   : > { %p971_p8 = pnand %p969_p6, %p966_p3 }
 0x54e   : > { %974 = shalt.err (!%p971_p8)
}
 0x54f   : > { %822 = dma.vmem_to_hbm [thread:$0]  (%p1160_p9), %s622_s15, 128, %s1197_s2, [#allocation6]  }
 0x550   : > { %996 = dma.done.wait (%p1160_p9), [#allocation6], 128  }
 0x551   : > { %998 = vsyncadd (%p1160_p9), [#allocation6], 4294967168 }
 0x552 PF: > { %s15_s11 = sadd.s32 1, %s1009_s11   ;;  %s1207_s9 = smov %s1005_s10 }
 0x553   : > { %p12_p4 = scmp.ge.s32.totalorder %s15_s11, 4   ;;  %s1208_s10 = smov %s1210_s13 }
 0x555   :  { %14 = sbr.rel (!%p12_p4) target bundleno = 4 (0x4), region = 75 }
 0x55c   :  { %634 = vsyncpa [#allocation5], 1 }
 0x55d   :  { %636 = vsyncpa [#allocation5 + $0x1], 1 }
 0x55e   :  { %637 = vsyncpa [#allocation8], 1 }
 0x55f   :  { %638 = vsyncpa [#allocation6], 1 }
 0x560   :  { %640 = vsyncpa [#allocation6 + $0x1], 1 }

</bundles_post_ra>
